<compile_context>
chip_gen: v6e
topology: v6e:2x2x1
jax: 0.10.0
libtpu: 0.0.40
codegen_flags: <defaults>
</compile_context>

<pallas_src>
import functools

import numpy as np

import jax
import jax.numpy as jnp
from jax.experimental import pallas as pl
from jax.experimental.pallas import tpu as pltpu


def _conv_relu_kernel(x_ref, t_ref, b_ref, o_ref, lhs_ref, *,
                      kh_sz, h_in, h_out, pad, nb, wc_in, wc_out):
    """One grid step == `nb` batch elements.

    x_ref   : (nb, H, W*Cin)          channel-minor input rows, compute dtype
    t_ref   : (KH*W*Cin, Wout*Cout)   block-Toeplitz weights (KW taps and the
                                      W zero-padding folded in), KH-major K
    b_ref   : (1, Wout*Cout)          bias tiled over Wout, f32
    o_ref   : (nb, Hout, Wout*Cout)   lane-dense output tile
    lhs_ref : (nb, Hout, KH*W*Cin)    VMEM scratch: im2col LHS for the fused dot
    """
    # Build the im2col LHS directly from the input block.  Per-tap boundary-
    # aware row copies implement the H zero-padding; only the few out-of-range
    # boundary rows are zeroed (every step, so correctness does not depend on
    # scratch state from other cores when the parallel axis is core-split).
    for kh in range(kh_sz):                               # static, unrolled
        r0 = max(0, pad - kh)
        r1 = min(h_out, h_in + pad - kh)
        if r0 > 0:
            lhs_ref[:, :r0, kh * wc_in:(kh + 1) * wc_in] = jnp.zeros(
                (nb, r0, wc_in), dtype=lhs_ref.dtype)
        if r1 < h_out:
            lhs_ref[:, r1:, kh * wc_in:(kh + 1) * wc_in] = jnp.zeros(
                (nb, h_out - r1, wc_in), dtype=lhs_ref.dtype)
        lhs_ref[:, r0:r1, kh * wc_in:(kh + 1) * wc_in] = (
            x_ref[:, r0 + kh - pad:r1 + kh - pad, :])

    # Single MXU dot: M = nb*Hout, K = KH*W*Cin, N = Wout*Cout, f32 acc.
    lhs = lhs_ref[...].reshape(nb * h_out, kh_sz * wc_in)
    acc = jnp.dot(lhs, t_ref[...], preferred_element_type=jnp.float32)

    # f32 epilogue: bias add + ReLU (activ='relu', norm='none'), cast, store.
    acc = jnp.maximum(acc + b_ref[...], 0.0)
    o_ref[...] = acc.reshape(nb, h_out, wc_out).astype(o_ref.dtype)


def _build_toeplitz(weight, w_in, w_out, stride, padding, compute_dtype):
    """Fold the KW taps + W zero-padding into one (KH*W*Cin, Wout*Cout) matrix.

    weight: (Cout, Cin, KH, KW)  ->  T with
    T[kh*(W*Cin) + wi*Cin + ci, w*Cout + co] = weight[co, ci, kh, kw] iff
                                  wi == w*stride + kw - padding (in range).
    The K ordering (kh major, then wi*Cin+ci) matches the in-kernel im2col.
    """
    c_out, c_in, kh_sz, kw_sz = weight.shape
    sel = np.zeros((kw_sz, w_in, w_out), np.float32)      # static, weights-only
    for kw in range(kw_sz):
        for w in range(w_out):
            wi = w * stride + kw - padding
            if 0 <= wi < w_in:
                sel[kw, wi, w] = 1.0
    t = jnp.einsum("kiw,ochk->hicwo", jnp.asarray(sel),
                   weight.astype(jnp.float32))
    t = t.reshape(kh_sz * w_in * c_in, w_out * c_out)
    return t.astype(compute_dtype)


def _pick_batch_block(n, h_out, m_max=256):
    """Images per grid step: largest divisor of n that (a) keeps >= 2 grid
    steps when n >= 2 (so both v7x TensorCores get a 'parallel' step) and
    (b) bounds the f32 accumulator / epilogue slab to m_max rows (stays well
    inside the 64-vreg file, no epilogue spills)."""
    best = 1
    for d in range(1, n + 1):
        if n % d:
            continue
        if d * h_out > m_max:
            continue
        if n >= 2 and n // d < 2:
            continue
        best = d
    return best


@functools.partial(jax.jit,
                   static_argnames=("stride", "padding", "compute_dtype",
                                    "out_dtype"))
def conv2d_relu(x_nchw, w_oihw, bias, *, stride=1, padding=0,
                compute_dtype=jnp.bfloat16, out_dtype=jnp.bfloat16):
    """Equivalent of Conv2d(...).forward with defaults activ='relu', norm='none'.

    Precision contract: inputs/weights are rounded to `compute_dtype` (bf16)
    for the MXU; accumulation and the bias+ReLU epilogue are f32; the result is
    emitted in `out_dtype` (bf16 by default).
    """
    assert stride == 1, "only stride=1 (module default) is implemented"
    n, c_in, h, w = x_nchw.shape
    c_out, c_in_w, kh_sz, kw_sz = w_oihw.shape
    assert c_in_w == c_in, "groups=1 (module default) is assumed"

    h_out = h + 2 * padding - kh_sz + 1
    w_out = w + 2 * padding - kw_sz + 1
    wc_in = w * c_in
    wc_out = w_out * c_out

    nb = _pick_batch_block(n, h_out)
    assert n % nb == 0
    n_steps = n // nb

    # NCHW -> (N, H, W*Cin) channel-minor rows: one layout transpose (the
    # reshape is free) fused by jit with the bf16 cast.  No jnp.pad: the W
    # padding lives in the Toeplitz weights, the H padding in the kernel.
    x_rows = jnp.transpose(x_nchw, (0, 2, 3, 1)).reshape(n, h, wc_in)
    x_rows = x_rows.astype(compute_dtype)

    t = _build_toeplitz(w_oihw, w, w_out, stride, padding, compute_dtype)
    b_tiled = jnp.tile(bias.astype(jnp.float32), w_out).reshape(1, wc_out)

    kernel = functools.partial(
        _conv_relu_kernel, kh_sz=kh_sz, h_in=h, h_out=h_out, pad=padding,
        nb=nb, wc_in=wc_in, wc_out=wc_out)

    out = pl.pallas_call(
        kernel,
        out_shape=jax.ShapeDtypeStruct((n, h_out, wc_out), out_dtype),
        grid_spec=pltpu.PrefetchScalarGridSpec(
            num_scalar_prefetch=0,
            grid=(n_steps,),
            in_specs=[
                pl.BlockSpec((nb, h, wc_in), lambda i: (i, 0, 0)),
                pl.BlockSpec((kh_sz * wc_in, wc_out), lambda i: (0, 0)),
                pl.BlockSpec((1, wc_out), lambda i: (0, 0)),
            ],
            out_specs=pl.BlockSpec((nb, h_out, wc_out), lambda i: (i, 0, 0)),
            scratch_shapes=[
                pltpu.VMEM((nb, h_out, kh_sz * wc_in), compute_dtype)],
        ),
        compiler_params=pltpu.CompilerParams(
            dimension_semantics=("parallel",)),
    )(x_rows, t, b_tiled)

    # (N, Hout, Wout*Cout) lane-dense -> NCHW (free reshape + one transpose,
    # done in the narrow output dtype).
    out = out.reshape(n, h_out, w_out, c_out)
    return jnp.transpose(out, (0, 3, 1, 2))


if __name__ == "__main__":
    # Module hyperparameters (synthetic, deterministic init).
    in_channels, out_channels, kernel_size, padding = 4, 8, 3, 1
    N, H, W = 2, 16, 16

    key = jax.random.PRNGKey(0)
    kx, kw, kb = jax.random.split(key, 3)

    x = jax.random.normal(kx, (N, in_channels, H, W), dtype=jnp.float32)
    # Kaiming-uniform-like deterministic init (shape matches nn.Conv2d weight).
    fan_in = in_channels * kernel_size * kernel_size
    bound = 1.0 / (fan_in ** 0.5)
    weight = jax.random.uniform(kw, (out_channels, in_channels, kernel_size,
                                     kernel_size),
                                minval=-bound, maxval=bound, dtype=jnp.float32)
    bias = jax.random.uniform(kb, (out_channels,), minval=-bound, maxval=bound,
                              dtype=jnp.float32)

    out = conv2d_relu(x, weight, bias, stride=1, padding=padding)
    out = jax.block_until_ready(out)

    # Reference: nn.Conv2d + ReLU semantics.  Inputs are rounded to the same
    # bf16 MXU precision the kernel uses (accumulation is f32 in both paths);
    # the kernel additionally emits bf16, so compare with bf16-level tolerance.
    xr = x.astype(jnp.bfloat16).astype(jnp.float32)
    wr = weight.astype(jnp.bfloat16).astype(jnp.float32)
    ref = jax.lax.conv_general_dilated(
        xr, wr, window_strides=(1, 1), padding=((padding, padding),) * 2,
        dimension_numbers=("NCHW", "OIHW", "NCHW"),
        precision=jax.lax.Precision.HIGHEST)
    ref = jnp.maximum(ref + bias[None, :, None, None], 0.0)

    assert out.shape == ref.shape == (N, out_channels, H, W)
    out_f32 = out.astype(jnp.float32)
    err = float(jnp.max(jnp.abs(out_f32 - ref)))
    assert jnp.allclose(out_f32, ref, rtol=2e-2, atol=2e-2), err

    print("KERNEL_OK")
</pallas_src>

<mosaic_0001>
module attributes {stable_mosaic.version = 11 : i64} {
  func.func @_conv_relu_kernel(%arg0: i32, %arg1: memref<1x16x64xbf16, #tpu.memory_space<vmem>>, %arg2: memref<192x128xbf16, #tpu.memory_space<vmem>>, %arg3: memref<1x128xf32, #tpu.memory_space<vmem>>, %arg4: memref<1x16x128xbf16, #tpu.memory_space<vmem>>, %arg5: memref<1x16x192xbf16, #tpu.memory_space<vmem>>) attributes {dimension_semantics = [#tpu.dimension_semantics<parallel>], iteration_bounds = array<i64: 2>, scalar_prefetch = 0 : i64, scratch_operands = 1 : i64, tpu.core_type = #tpu.core_type<tc>, window_params = [{transform_indices = @transform_0, window_bounds = array<i64: 1, 16, 64>}, {pipeline_mode = #tpu.pipeline_mode<synchronous>, transform_indices = @transform_1, window_bounds = array<i64: 192, 128>}, {pipeline_mode = #tpu.pipeline_mode<synchronous>, transform_indices = @transform_2, window_bounds = array<i64: 1, 128>}, {transform_indices = @transform_3, window_bounds = array<i64: 1, 16, 128>}]} {
    %cst = arith.constant 0.000000e+00 : bf16
    %0 = vector.broadcast %cst : bf16 to vector<1x1x64xbf16>
    %c0 = arith.constant 0 : index
    %c0_0 = arith.constant 0 : index
    %c0_1 = arith.constant 0 : index
    %1 = vector.load %arg5[%c0, %c0_0, %c0_1] : memref<1x16x192xbf16, #tpu.memory_space<vmem>>, vector<1x1x64xbf16>
    tpu.vector_store %arg5[%c0, %c0_0, %c0_1], %0 {strides = array<i32>} : memref<1x16x192xbf16, #tpu.memory_space<vmem>>, vector<1x1x64xbf16>,
    %c0_2 = arith.constant 0 : index
    %c0_3 = arith.constant 0 : index
    %c0_4 = arith.constant 0 : index
    %2 = vector.load %arg1[%c0_2, %c0_3, %c0_4] : memref<1x16x64xbf16, #tpu.memory_space<vmem>>, vector<1x15x64xbf16>
    %c0_5 = arith.constant 0 : index
    %c1 = arith.constant 1 : index
    %c0_6 = arith.constant 0 : index
    %3 = vector.load %arg5[%c0_5, %c1, %c0_6] : memref<1x16x192xbf16, #tpu.memory_space<vmem>>, vector<1x15x64xbf16>
    tpu.vector_store %arg5[%c0_5, %c1, %c0_6], %2 {strides = array<i32>} : memref<1x16x192xbf16, #tpu.memory_space<vmem>>, vector<1x15x64xbf16>,
    %c0_7 = arith.constant 0 : index
    %c0_8 = arith.constant 0 : index
    %c0_9 = arith.constant 0 : index
    %4 = vector.load %arg1[%c0_7, %c0_8, %c0_9] : memref<1x16x64xbf16, #tpu.memory_space<vmem>>, vector<1x16x64xbf16>
    %c0_10 = arith.constant 0 : index
    %c0_11 = arith.constant 0 : index
    %c64 = arith.constant 64 : index
    %5 = vector.load %arg5[%c0_10, %c0_11, %c64] : memref<1x16x192xbf16, #tpu.memory_space<vmem>>, vector<1x16x64xbf16>
    tpu.vector_store %arg5[%c0_10, %c0_11, %c64], %4 {strides = array<i32>} : memref<1x16x192xbf16, #tpu.memory_space<vmem>>, vector<1x16x64xbf16>,
    %cst_12 = arith.constant 0.000000e+00 : bf16
    %6 = vector.broadcast %cst_12 : bf16 to vector<1x1x64xbf16>
    %c0_13 = arith.constant 0 : index
    %c15 = arith.constant 15 : index
    %c128 = arith.constant 128 : index
    %7 = vector.load %arg5[%c0_13, %c15, %c128] : memref<1x16x192xbf16, #tpu.memory_space<vmem>>, vector<1x1x64xbf16>
    tpu.vector_store %arg5[%c0_13, %c15, %c128], %6 {strides = array<i32>} : memref<1x16x192xbf16, #tpu.memory_space<vmem>>, vector<1x1x64xbf16>,
    %c0_14 = arith.constant 0 : index
    %c1_15 = arith.constant 1 : index
    %c0_16 = arith.constant 0 : index
    %8 = vector.load %arg1[%c0_14, %c1_15, %c0_16] : memref<1x16x64xbf16, #tpu.memory_space<vmem>>, vector<1x15x64xbf16>
    %c0_17 = arith.constant 0 : index
    %c0_18 = arith.constant 0 : index
    %c128_19 = arith.constant 128 : index
    %9 = vector.load %arg5[%c0_17, %c0_18, %c128_19] : memref<1x16x192xbf16, #tpu.memory_space<vmem>>, vector<1x15x64xbf16>
    tpu.vector_store %arg5[%c0_17, %c0_18, %c128_19], %8 {strides = array<i32>} : memref<1x16x192xbf16, #tpu.memory_space<vmem>>, vector<1x15x64xbf16>,
    %c0_20 = arith.constant 0 : index
    %c0_21 = arith.constant 0 : index
    %c0_22 = arith.constant 0 : index
    %10 = vector.load %arg5[%c0_20, %c0_21, %c0_22] : memref<1x16x192xbf16, #tpu.memory_space<vmem>>, vector<1x16x192xbf16>
    %11 = vector.shape_cast %10 : vector<1x16x192xbf16> to vector<16x192xbf16>
    %c0_23 = arith.constant 0 : index
    %c0_24 = arith.constant 0 : index
    %12 = vector.load %arg2[%c0_23, %c0_24] : memref<192x128xbf16, #tpu.memory_space<vmem>>, vector<192x128xbf16>
    %cst_25 = arith.constant dense<0.000000e+00> : vector<16x128xf32>
    %13 = tpu.matmul %11, %12, %cst_25 {dimension_numbers = #tpu.dot_dimension_numbers<[1], [0], [0], [1], [0, 0, 1, 1], [], []>} : vector<16x192xbf16>, vector<192x128xbf16>, vector<16x128xf32> -> vector<16x128xf32>
    %c0_26 = arith.constant 0 : index
    %c0_27 = arith.constant 0 : index
    %14 = vector.load %arg3[%c0_26, %c0_27] : memref<1x128xf32, #tpu.memory_space<vmem>>, vector<1x128xf32>
    %15 = vector.broadcast %14 : vector<1x128xf32> to vector<16x128xf32>
    %16 = arith.addf %13, %15 : vector<16x128xf32>
    %cst_28 = arith.constant 0.000000e+00 : f32
    %17 = vector.broadcast %cst_28 : f32 to vector<16x128xf32>
    %18 = arith.maximumf %16, %17 : vector<16x128xf32>
    %19 = vector.shape_cast %18 : vector<16x128xf32> to vector<1x16x128xf32>
    %20 = arith.truncf %19 : vector<1x16x128xf32> to vector<1x16x128xbf16>
    %c0_29 = arith.constant 0 : index
    %c0_30 = arith.constant 0 : index
    %c0_31 = arith.constant 0 : index
    %21 = vector.load %arg4[%c0_29, %c0_30, %c0_31] : memref<1x16x128xbf16, #tpu.memory_space<vmem>>, vector<1x16x128xbf16>
    tpu.vector_store %arg4[%c0_29, %c0_30, %c0_31], %20 {strides = array<i32>} : memref<1x16x128xbf16, #tpu.memory_space<vmem>>, vector<1x16x128xbf16>,
    return
  }
  func.func @transform_0(%arg0: i32) -> (i32, i32, i32) {
    %c0_i32 = arith.constant 0 : i32
    %c0_i32_0 = arith.constant 0 : i32
    %c0_i32_1 = arith.constant 0 : i32
    return %arg0, %c0_i32, %c0_i32_0 : i32, i32, i32
  }
  func.func @transform_1(%arg0: i32) -> (i32, i32) {
    %c0_i32 = arith.constant 0 : i32
    %c0_i32_0 = arith.constant 0 : i32
    %c0_i32_1 = arith.constant 0 : i32
    return %c0_i32, %c0_i32_0 : i32, i32
  }
  func.func @transform_2(%arg0: i32) -> (i32, i32) {
    %c0_i32 = arith.constant 0 : i32
    %c0_i32_0 = arith.constant 0 : i32
    %c0_i32_1 = arith.constant 0 : i32
    return %c0_i32, %c0_i32_0 : i32, i32
  }
  func.func @transform_3(%arg0: i32) -> (i32, i32, i32) {
    %c0_i32 = arith.constant 0 : i32
    %c0_i32_0 = arith.constant 0 : i32
    %c0_i32_1 = arith.constant 0 : i32
    return %arg0, %c0_i32, %c0_i32_0 : i32, i32, i32
  }
}

</mosaic_0001>

<bundles_post_ra>
// kernel: tile.9
= control target key start
LH: loop header
LB: loop body
LE: loop exit
PB: predicated region body
PF: predicated region fallthrough
CT: control target
= control target key end

     0   :  { %s133_s10 = smov 120   ;;  %s134_s11 = smov 104   ;;  %vm3_vm0 = vcmask 64512   ;;  %vm9_vm1 = vcmask 1048512   ;;  %vm15_vm2 = vcmask 982912   ;;  %vm21_vm3 = vcmask 917312   ;;  %s209_s0 = inlined_call_operand.vmem [shape: f32[16,8], index: 0, kind: input, shape index: {}]   ;;  %s210_s1 = inlined_call_operand.vmem [shape: f32[1,128], index: 1, kind: output, shape index: {}]  }
   0x1   :  { %v103_v0 = vld [vmem:[%s209_s0 + $0xf] sm:$0x1]   ;;  %v105_v1 = vld [vmem:[%s209_s0 + $0xd] sm:$0x1]   ;;  %v104_v2 = vld [vmem:[%s209_s0 + $0xe] sm:$0x1]  }
   0x2   :  { %7 = vrot.lane.b32.xlu0 %v103_v0, %s133_s10  ;;  %19 = vrot.lane.b32.xlu1 %v105_v1, %s134_s11  ;;  %v106_v3 = vld [vmem:[%s209_s0 + $0xc] sm:$0x1]   ;;  %s135_s16 = smov 112   ;;  %s136_s17 = smov 96   ;;  %v107_v4 = vld [vmem:[%s209_s0 + $0xb] sm:$0x1]  }
   0x3   :  { %v108_v5 = vld [vmem:[%s209_s0 + $0xa] sm:$0x1]   ;;  %v2_v6 = vld [vmem:[%s209_s0] sm:$0x1]   ;;  %s137_s24 = smov 88   ;;  %s138_s25 = smov 80  }
   0x4   :  { %4 = vst.msk [vmem:[#allocation0] sm:$0x1] %vm3_vm0, %v2_v6   ;;  %v109_v7 = vld [vmem:[%s209_s0 + $0x9] sm:$0x1]   ;;  %v110_v8 = vld [vmem:[%s209_s0 + $0x8] sm:$0x1]  }
   0x5   :  { %s139_s30 = smov 72   ;;  %s140_s2 = smov 64   ;;  %v111_v9 = vld [vmem:[%s209_s0 + $0x7] sm:$0x1]   ;;  %v112_v10 = vld [vmem:[%s209_s0 + $0x6] sm:$0x1]  }
   0x6   :  { %13 = vrot.lane.b32.xlu0 %v104_v2, %s135_s16  ;;  %25 = vrot.lane.b32.xlu1 %v106_v3, %s136_s17  ;;  %s141_s7 = smov 56   ;;  %s142_s8 = smov 48   ;;  %v113_v11 = vld [vmem:[%s209_s0 + $0x5] sm:$0x1]   ;;  %v114_v12 = vld [vmem:[%s209_s0 + $0x4] sm:$0x1]  }
   0x7   :  { %s143_s13 = smov 40   ;;  %s144_s14 = smov 32   ;;  %v115_v13 = vld [vmem:[%s209_s0 + $0x3] sm:$0x1]   ;;  %v116_v14 = vld [vmem:[%s209_s0 + $0x2] sm:$0x1]  }
   0x8   :  { %s145_s19 = smov 24   ;;  %s146_s20 = smov 16   ;;  %v117_v15 = vld [vmem:[%s209_s0 + $0x1] sm:$0x1]   ;;  %vm27_vm4 = vcmask 851712   ;;  %vm33_vm5 = vcmask 786112  }
   0x9   :  { %s147_s0 = smov 8   ;;  %vm39_vm6 = vcmask 720512   ;;  %vm45_vm7 = vcmask 654912   ;;  %vm51_vm8 = vcmask 589312   ;;  %vm57_vm9 = vcmask 523712  }
   0xa   :  { %31 = vrot.lane.b32.xlu0 %v107_v4, %s137_s24  ;;  %37 = vrot.lane.b32.xlu1 %v108_v5, %s138_s25  ;;  %vm63_vm10 = vcmask 458112   ;;  %vm69_vm11 = vcmask 392512   ;;  %vm75_vm12 = vcmask 326912   ;;  %vm81_vm13 = vcmask 261312  }
   0xb   :  { %vm87_vm14 = vcmask 195712   ;;  %vm93_vm15 = vcmask 130112  }
   0xe   :  { %43 = vrot.lane.b32.xlu0 %v109_v7, %s139_s30  ;;  %49 = vrot.lane.b32.xlu1 %v110_v8, %s140_s2 }
  0x12   :  { %55 = vrot.lane.b32.xlu0 %v111_v9, %s141_s7  ;;  %61 = vrot.lane.b32.xlu1 %v112_v10, %s142_s8 }
  0x16   :  { %67 = vrot.lane.b32.xlu0 %v113_v11, %s143_s13  ;;  %73 = vrot.lane.b32.xlu1 %v114_v12, %s144_s14 }
  0x1a   :  { %79 = vrot.lane.b32.xlu0 %v115_v13, %s145_s19  ;;  %85 = vrot.lane.b32.xlu1 %v116_v14, %s146_s20 }
  0x1e   :  { %91 = vrot.lane.b32.xlu0 %v117_v15, %s147_s0 }
  0x74   :  { %v8_v16 = vpop.permute.xlu0 %7   ;;  %v20_v17 = vpop.permute.xlu1 %19  }
  0x75   :  { %10 = vst.msk [vmem:[#allocation0] sm:$0x1] %vm9_vm1, %v8_v16  }
  0x78   :  { %v14_v18 = vpop.permute.xlu0 %13   ;;  %v26_v19 = vpop.permute.xlu1 %25  }
  0x79   :  { %16 = vst.msk [vmem:[#allocation0] sm:$0x1] %vm15_vm2, %v14_v18  }
  0x7a   :  { %22 = vst.msk [vmem:[#allocation0] sm:$0x1] %vm21_vm3, %v20_v17  }
  0x7b   :  { %28 = vst.msk [vmem:[#allocation0] sm:$0x1] %vm27_vm4, %v26_v19  }
  0x7c   :  { %v32_v20 = vpop.permute.xlu0 %31   ;;  %v38_v21 = vpop.permute.xlu1 %37  }
  0x7d   :  { %34 = vst.msk [vmem:[#allocation0] sm:$0x1] %vm33_vm5, %v32_v20  }
  0x7e   :  { %40 = vst.msk [vmem:[#allocation0] sm:$0x1] %vm39_vm6, %v38_v21  }
  0x80   :  { %v44_v22 = vpop.permute.xlu0 %43   ;;  %v50_v23 = vpop.permute.xlu1 %49  }
  0x81   :  { %46 = vst.msk [vmem:[#allocation0] sm:$0x1] %vm45_vm7, %v44_v22  }
  0x82   :  { %52 = vst.msk [vmem:[#allocation0] sm:$0x1] %vm51_vm8, %v50_v23  }
  0x84   :  { %v56_v24 = vpop.permute.xlu0 %55   ;;  %v62_v25 = vpop.permute.xlu1 %61  }
  0x85   :  { %58 = vst.msk [vmem:[#allocation0] sm:$0x1] %vm57_vm9, %v56_v24  }
  0x86   :  { %64 = vst.msk [vmem:[#allocation0] sm:$0x1] %vm63_vm10, %v62_v25  }
  0x88   :  { %v68_v26 = vpop.permute.xlu0 %67   ;;  %v74_v27 = vpop.permute.xlu1 %73  }
  0x89   :  { %70 = vst.msk [vmem:[#allocation0] sm:$0x1] %vm69_vm11, %v68_v26  }
  0x8a   :  { %76 = vst.msk [vmem:[#allocation0] sm:$0x1] %vm75_vm12, %v74_v27  }
  0x8c   :  { %v80_v28 = vpop.permute.xlu0 %79   ;;  %v86_v29 = vpop.permute.xlu1 %85  }
  0x8d   :  { %82 = vst.msk [vmem:[#allocation0] sm:$0x1] %vm81_vm13, %v80_v28  }
  0x8e   :  { %88 = vst.msk [vmem:[#allocation0] sm:$0x1] %vm87_vm14, %v86_v29  }
  0x90   :  { %v92_v30 = vpop.permute.xlu0 %91  }
  0x91   :  { %94 = vst.msk [vmem:[#allocation0] sm:$0x1] %vm93_vm15, %v92_v30  }
  0x98   :  { %v99_v31 = vld [vmem:[#allocation0] sm:$0x1] }
  0x99   :  { %102 = vst [vmem:[%s210_s1] sm:$0x1] %v99_v31 }

// kernel: tile.8
= control target key start
LH: loop header
LB: loop body
LE: loop exit
PB: predicated region body
PF: predicated region fallthrough
CT: control target
= control target key end

     0   :  { %s28_s0 = inlined_call_operand.vmem [shape: f32[8], index: 0, kind: input, shape index: {}]   ;;  %s29_s1 = inlined_call_operand.vmem [shape: f32[16,8], index: 1, kind: output, shape index: {}]  }
   0x1   :  { %v4_v0 = vld [vmem:[%s28_s0] ss:$0 sm:$0xff] }
   0x2   :  { %5 = vst [vmem:[%s29_s1] sm:$0xff] %v4_v0  ;;  %8 = vst [vmem:[%s29_s1 + $0x8] sm:$0xff] %v4_v0 }

// kernel: conv2d_relu.1
= control target key start
LH: loop header
LB: loop body
LE: loop exit
PB: predicated region body
PF: predicated region fallthrough
CT: control target
= control target key end

     0   :  { %s577_s12 = smov 0   ;;  %s677_s0 = inlined_call_operand.vmem [shape: bf16[2,16,64], index: 0, kind: input, shape index: {}]   ;;  %s678_s1 = inlined_call_operand.vmem [shape: bf16[192,128], index: 1, kind: input, shape index: {}]   ;;  %s679_s2 = inlined_call_operand.vmem [shape: f32[1,128], index: 2, kind: input, shape index: {}]   ;;  %s680_s3 = inlined_call_operand.vmem [shape: bf16[2,16,128], index: 3, kind: output, shape index: {}]  }
   0x1 LB: > { %s484_s13 = sadd.s32 4294967295, %s553_s12   ;;  %p488_p0 = scmp.ge.s32.totalorder %s553_s12, 1  ;;  %s553_s12 = sphi %s577_s12, %s13_s12  }
   0x2   : > { %p137_p1 = scmp.lt.s32.totalorder %s553_s12, 3 }
   0x4   : > { %p138_p2 = pnand %p488_p0, %p137_p1 }
   0x5   : > { %p161_p3 = scmp.lt.s32.totalorder (!%p138_p2), %s484_s13, 1  ;;  %s556_s24 = smov (!%p138_p2), 64  }
   0x6   : > { %141 = sbr.rel (%p138_p2) target bundleno = 346 (0x15a), region = 32 }
   0xb   : > { %v532_v0 = vld [vmem:[%s678_s1 + $0x38] sm:$0xff]   ;;  %v555_v1 = vmov 0   ;;  %s684_s13 = smov (!%p161_p3, %s484_s13), 1  ;;  %v533_v2 = vld [vmem:[%s678_s1 + $0x30] sm:$0xff]   ;;  %v534_v3 = vld [vmem:[%s678_s1 + $0x28] sm:$0xff]   ;;  %vm172_vm0 = vcmask 516096  }
   0xc   : > { %376 = vmatprep.subr.bf16.mxu0 %v555_v1  ;;  %s513_s18 = sshll.u32 %s684_s13, 3  ;;  %v535_v10 = vld [vmem:[%s678_s1 + $0x20] sm:$0xff]   ;;  %vm200_vm1 = vcmask 519168   ;;  %vm173_vm2 = vsmask.f32 256  ;;  %vm221_vm3 = vcmask 519171  }
   0xd   : > { %377 = vmatpush1.bf16.msra.mxu0 %v532_v0  ;;  %s601_s21 = scalar_lea.vmem %s677_s0, %s513_s18  ;;  %v175_v13 = vld [vmem:[#allocation2] sm:$0x1]  ;;  %v536_v14 = vld [vmem:[%s678_s1 + $0x18] sm:$0xff]   ;;  %vm174_vm4 = vmand %vm172_vm0, %vm173_vm2  ;;  %vm180_vm5 = vsmask.f32 4368  ;;  %vm218_vm15 = vcmask 1043968   ;;  %s170_s23 = scalar_lea.vmem %s680_s3, %s513_s18 }
   0xe   : > { %378 = vmatprep.subr.bf16.mxu0 %v555_v1  ;;  %v208_v4 = vld [vmem:[%s601_s21] sm:$0xf]  ;;  %v228_v6 = vld [vmem:[%s601_s21 + $0x4] sm:$0xf]  ;;  %vm222_vm6 = vsmask.f32 7950  ;;  %vm181_vm12 = vmor %vm173_vm2, %vm180_vm5 }
   0xf   : > { %v227_v5 = vld [vmem:[%s601_s21] sm:$0xf]  ;;  %v246_v7 = vshrl.u32 %v228_v6, 16  ;;  %212 = vrot.lane.b32.xlu0 %v208_v4, %s556_s24  ;;  %v209_v8 = vld [vmem:[%s601_s21 + $0x4] sm:$0xf]  ;;  %v176_v16 = vsel %vm174_vm4, 0, %v175_v13  ;;  %vm223_vm9 = vmand %vm221_vm3, %vm222_vm6 }
  0x10   : > { %v233_v9 = vshrl.u32 %v227_v5, 16  ;;  %v236_v11 = vshll.u32 %v227_v5, 16  ;;  %v224_v15 = vld [vmem:[#allocation2 + $0xc] sm:$0x8]  ;;  %vm229_vm7 = vsmask.f32 3328 }
  0x11   : > { %379 = vmatpush1.bf16.msra.mxu0 %v533_v2  ;;  %v248_v12 = vrot.slane %v246_v7, 4  ;;  %vm230_vm8 = vsmask.f32 7440  ;;  %177 = vst [vmem:[#allocation2] sm:$0x1] %v176_v16  ;;  %v242_v19 = vshll.u32 %v228_v6, 16  ;;  %vm254_vm14 = vmand %vm200_vm1, %vm229_vm7 }
  0x12   : > { %380 = vmatprep.subr.bf16.mxu0 %v555_v1  ;;  %v235_v17 = vrot.slane %v233_v9, 4  ;;  %v238_v18 = vrot.slane %v236_v11, 5  ;;  %v178_v20 = vld [vmem:[%s601_s21] sm:$0xf]  ;;  %v179_v21 = vld [vmem:[%s601_s21 + $0x4] sm:$0xf]  ;;  %vm628_vm11 = vmor %vm229_vm7, %vm230_vm8 }
  0x13   : > { %214 = vrot.lane.b32.xlu0 %v209_v8, %s556_s24  ;;  %v183_v22 = vshrl.u32 %v178_v20, 16  ;;  %v186_v23 = vshll.u32 %v178_v20, 16  ;;  %v191_v24 = vshrl.u32 %v179_v21, 16  ;;  %v194_v25 = vshll.u32 %v179_v21, 16  ;;  %v537_v26 = vld [vmem:[%s678_s1 + $0x10] sm:$0xff]   ;;  %v538_v42 = vld [vmem:[%s678_s1 + $0x8] sm:$0xff]  }
  0x14   : > { %vm201_vm10 = vsmask.f32 7938  ;;  %v225_v27 = vsel %vm223_vm9, 0, %v224_v15  ;;  %v239_v28 = vor.u32 %v238_v18, %v235_v17  ;;  %v244_v29 = vrot.slane %v242_v19, 5  ;;  %v539_v46 = vld [vmem:[%s678_s1] sm:$0xff]   ;;  %v540_v47 = vld [vmem:[%s678_s1 + $0x58] sm:$0xff]  }
  0x15   : > { %381 = vmatpush1.bf16.msra.mxu0 %v534_v3  ;;  %226 = vst [vmem:[#allocation2 + $0xc] sm:$0x8] %v225_v27  ;;  %v185_v31 = vrot.slane %v183_v22, 7  ;;  %v193_v32 = vrot.slane %v191_v24, 7  ;;  %vm202_vm13 = vmand %vm200_vm1, %vm201_vm10  ;;  %v541_v48 = vld [vmem:[%s678_s1 + $0x50] sm:$0xff]   ;;  %v542_v49 = vld [vmem:[%s678_s1 + $0x48] sm:$0xff]  }
  0x16   : > { %382 = vmatprep.subr.bf16.mxu0 %v555_v1  ;;  %v240_v33 = vrot.slane %v239_v28, 4  ;;  %v249_v34 = vor.u32 %v248_v12, %v244_v29  ;;  %v543_v50 = vld [vmem:[%s678_s1 + $0x40] sm:$0xff]   ;;  %vm372_vm0 = vcmask 523264  }
  0x17   : > { %v188_v35 = vor.u32 %v186_v23, %v185_v31  ;;  %v189_v36 = vrot.slane %v185_v31, 4  ;;  %v196_v37 = vor.u32 %v194_v25, %v193_v32  ;;  %v493_v55 = vld [vmem:[%s679_s2] ss:$0 sm:$0xff] }
  0x18   : > { %v245_v38 = vsel %vm628_vm11, %v240_v33, %v244_v29  ;;  %v203_v39 = vld [vmem:[#allocation2] sm:$0xf]  ;;  %v250_v40 = vrot.slane %v249_v34, 4 }
  0x19   : > { %383 = vmatpush1.bf16.msra.mxu0 %v535_v10  ;;  %253 = vst.msk [vmem:[#allocation2 + $0x4] sm:$0xf] %vm200_vm1, %v245_v38  ;;  %v197_v41 = vsel %vm181_vm12, %v189_v36, %v196_v37  ;;  %v204_v43 = vsel %vm202_vm13, %v188_v35, %v203_v39 }
  0x1a   : > { %384 = vmatprep.subr.bf16.mxu0 %v555_v1  ;;  %207 = vst.msk [vmem:[#allocation2 + $0x8] sm:$0xf] %vm200_vm1, %v197_v41  ;;  %205 = vst [vmem:[#allocation2] sm:$0xf] %v204_v43 }
  0x1c   : > { %v255_v44 = vld [vmem:[#allocation2 + $0xc] sm:$0xf] }
  0x1d   : > { %385 = vmatpush1.bf16.msra.mxu0 %v536_v14  ;;  %v256_v45 = vsel %vm254_vm14, %v250_v40, %v255_v44 }
  0x1e   : > { %386 = vmatprep.subr.bf16.mxu0 %v555_v1  ;;  %257 = vst [vmem:[#allocation2 + $0xc] sm:$0xf] %v256_v45 }
  0x21   : > { %387 = vmatpush1.bf16.msra.mxu0 %v537_v26 }
  0x22   : > { %388 = vmatprep.subr.bf16.mxu0 %v555_v1 }
  0x25   : > { %389 = vmatpush1.bf16.msra.mxu0 %v538_v42  ;;  %v546_v54 = vld [vmem:[#allocation2 + $0x4] ss:$8 sps:$4 sm:$0xff]  }
  0x26   : > { %390 = vmatprep.subr.bf16.mxu0 %v555_v1  ;;  %508 = vmatprep.mubr.msk.bf16.mxu0 %vm372_vm0, %v546_v54 }
  0x29   : > { %391 = vmatpush1.bf16.msra.mxu0 %v539_v46 }
  0x2a   : > { %400 = vmatprep.subr.bf16.mxu0 %v555_v1 }
  0x2d   : > { %401 = vmatpush2.bf16.msra.mxu0 %v540_v47 }
  0x2e   : > { %402 = vmatprep.subr.bf16.mxu0 %v555_v1 }
  0x31   : > { %403 = vmatpush2.bf16.msra.mxu0 %v541_v48 }
  0x32   : > { %404 = vmatprep.subr.bf16.mxu0 %v555_v1 }
  0x35   : > { %405 = vmatpush2.bf16.msra.mxu0 %v542_v49 }
  0x36   : > { %406 = vmatprep.subr.bf16.mxu0 %v555_v1 }
  0x39   : > { %407 = vmatpush2.bf16.msra.mxu0 %v543_v50 }
  0x81   : > { %v213_v51 = vpop.permute.xlu0 %212 }
  0x82   : > { %219 = vst.msk [vmem:[#allocation2] sm:$0xf] %vm218_vm15, %v213_v51 }
  0x85   : > { %v215_v52 = vpop.permute.xlu0 %214 }
  0x86   : > { %220 = vst.msk [vmem:[#allocation2 + $0x8] sm:$0xf] %vm218_vm15, %v215_v52 }
  0x8d   : > { %v544_v53 = vld [vmem:[#allocation2] ss:$8 sps:$4 sm:$0xff]  }
  0x8e   : > { %409 = vmatmul.mubr.bf16.vlgmr.msra.gmra.mxu0 %v544_v53 }
 0x14e   : > { %v410_v56 = vpop.f32.mrf.mxu0 }
 0x14f   : > { %v411_v58 = vadd.f32 %v493_v55, %v410_v56 }
 0x150   : > { %v412_v57 = vpop.f32.mrf.mxu0 }
 0x151   : > { %v417_v62 = vmax.f32 %v411_v58, 0.0 }
 0x152   : > { %v413_v59 = vpop.f32.mrf.mxu0 }
 0x153   : > { %v414_v60 = vadd.f32 %v493_v55, %v413_v59 }
 0x154   : > { %v415_v61 = vpop.f32.mrf.mxu0 }
 0x155   : > { %v418_v63 = vmax.f32 %v414_v60, 0.0 }
 0x157   : > { %v520_v0 = vpack.c.bf16 %v418_v63, %v417_v62 }
 0x159   : > { %521 = vst [vmem:[%s170_s23] sm:$0xff] %v520_v0  }
 0x15a PF: > { %s13_s12 = sadd.s32 1, %s553_s12  }
 0x15b   : > { %p10_p4 = scmp.ge.s32.totalorder %s13_s12, 4  }
 0x15d   :  { %12 = sbr.rel (!%p10_p4) target bundleno = 1 (0x1), region = 62 }

</bundles_post_ra>
